<compile_context>
chip_gen: v6e
topology: v6e:2x2x1
jax: 0.10.0
libtpu: 0.0.40
codegen_flags: <defaults>
</compile_context>

<pallas_src>
import functools

import jax
import jax.numpy as jnp
from jax import lax
from jax.experimental import pallas as pl
from jax.experimental.pallas import tpu as pltpu


def _complex_conv1d_kernel(x_ref, w_ref, b_ref, o_ref, carry_ref, acc_ref,
                           *, k_size, dilation, pad):
    """One (pair, time-tile) step of the fused complex causal conv.

    x_ref    : (1, 2*C_in, T_tile)      bf16  [x_real ; x_imag] channel slab
    w_ref    : (K, 2*C_out, 2*C_in)     bf16  resident block weight
    b_ref    : (2*C_out, 1)             f32   resident combined bias
    o_ref    : (1, 2*C_out, T_tile)     f32
    carry_ref: (2*C_in, max(pad, 1))    bf16  last `pad` cols of previous tile
    acc_ref  : (2*C_out, T_tile)        f32   accumulator scratch
    """
    cout2, t_tile = acc_ref.shape
    t_idx = pl.program_id(1)

    x = x_ref[0, :, :]                       # (2*C_in, T_tile)

    if pad > 0:
        @pl.when(t_idx == 0)
        def _():                              # causal left padding of the pair
            carry_ref[...] = jnp.zeros_like(carry_ref)
        carry = carry_ref[...]                # (2*C_in, pad)

    # Bias init: single broadcast + store, hoisted out of the tap loop.
    acc_ref[...] = jnp.broadcast_to(b_ref[...], (cout2, t_tile))

    # Static tap unroll (K is tiny).  Partial matmuls are accumulated at
    # column offsets into the VMEM accumulator, so no padded / concatenated
    # copy of the input tile is ever materialized.
    for k in range(k_size):
        d = (k_size - 1 - k) * dilation       # causal look-back of tap k
        w_k = w_ref[k]                        # (2*C_out, 2*C_in)
        if d == 0:
            acc_ref[...] += jnp.dot(w_k, x, preferred_element_type=jnp.float32)
        else:
            acc_ref[:, pl.ds(d, t_tile - d)] += jnp.dot(
                w_k, x[:, :t_tile - d], preferred_element_type=jnp.float32)
            acc_ref[:, pl.ds(0, d)] += jnp.dot(
                w_k, carry[:, pad - d:], preferred_element_type=jnp.float32)

    if pad > 0:                               # halo for the next time tile
        carry_ref[...] = x[:, t_tile - pad:]

    o_ref[0, :, :] = acc_ref[...].astype(o_ref.dtype)


def complex_conv1d(x, w_real, w_imag, b_real, b_imag, *, dilation=1,
                   t_tile=None, compute_dtype=jnp.bfloat16):
    """ComplexConv1d forward (complex_axis=0, causal, stride=1, groups=1).

    x       : (2B, C_in, T); first B batch rows = real part, last B = imag.
    w_real/w_imag : (C_out, C_in, K);  b_real/b_imag : (C_out,)
    returns : (2B, C_out, T) float32 in the same NCT layout as PyTorch.
    """
    # TODO(synk): stride>1, groups>1, pad_mode in ('same','valid') and
    #             complex_axis=1 are not supported here (module defaults).
    two_b, c_in, t = x.shape
    if two_b % 2:
        raise ValueError("complex_axis=0 requires an even batch dimension")
    b = two_b // 2
    c_out, c_in_w, k_size = w_real.shape
    assert c_in_w == c_in and w_imag.shape == w_real.shape
    cin2, cout2 = 2 * c_in, 2 * c_out
    pad = dilation * (k_size - 1)             # causal left pad (stride == 1)

    # ---- lane-dense time tiling, budgeted for v7x's 64 MiB VMEM ------------
    if t_tile is None:
        t_cols = -(-t // 128) * 128           # round T up to a lane multiple
        per_col = 2 * cin2 * 2 + 2 * cout2 * 4 + cout2 * 4
        budget = 24 * 1024 * 1024
        t_tile = max(128, (budget // per_col) // 128 * 128)
        t_tile = min(t_tile, 1024, t_cols)
    assert t_tile % 128 == 0, "T tile must be a lane multiple"
    if pad > t_tile:
        raise NotImplementedError("dilation*(kernel_size-1) must be <= t_tile")
    n_t = -(-t // t_tile)
    t_pad = n_t * t_tile

    # ---- one-time operand prep (no per-grid-step work) ----------------------
    #   out_real = W_r x_r - W_i x_i + (b_r - b_i)
    #   out_imag = W_i x_r + W_r x_i + (b_r + b_i)
    w_top = jnp.concatenate([w_real, -w_imag], axis=1)            # (C_out,2C_in,K)
    w_bot = jnp.concatenate([w_imag, w_real], axis=1)
    w_big = jnp.concatenate([w_top, w_bot], axis=0)               # (2C_out,2C_in,K)
    w_big = jnp.transpose(w_big, (2, 0, 1)).astype(compute_dtype)  # (K,2C_out,2C_in)
    b_big = jnp.concatenate([b_real - b_imag, b_real + b_imag])[:, None]
    b_big = b_big.astype(jnp.float32)                             # (2C_out, 1)

    # (2B, C_in, T) -> (B, 2*C_in, T): per pair, real channels then imag
    # channels stacked on the sublane axis (one-time HBM rearrange), so the
    # kernel sees a (2C_in, T_tile) slab directly.
    xb = jnp.transpose(x.reshape(2, b, c_in, t), (1, 0, 2, 3))
    xb = xb.reshape(b, cin2, t).astype(compute_dtype)
    if t_pad != t:
        xb = jnp.pad(xb, ((0, 0), (0, 0), (0, t_pad - t)))        # lane-dense T

    # ---- explicit VMEM budget ------------------------------------------------
    footprint = (2 * cin2 * t_tile * 2            # x double buffer (bf16)
                 + 2 * cout2 * t_tile * 4         # out double buffer (f32)
                 + cout2 * t_tile * 4             # f32 accumulator scratch
                 + 2 * k_size * cout2 * cin2 * 2  # resident weights
                 + cin2 * max(pad, 1) * 2 + cout2 * 8)
    vmem_limit = int(min(max(2 * footprint, 32 * 1024 * 1024),
                         100 * 1024 * 1024))

    grid_spec = pltpu.PrefetchScalarGridSpec(
        num_scalar_prefetch=0,
        grid=(b, n_t),                        # pairs (parallel) x time (carry)
        in_specs=[
            pl.BlockSpec((1, cin2, t_tile), lambda i, j: (i, 0, j)),
            pl.BlockSpec((k_size, cout2, cin2), lambda i, j: (0, 0, 0)),
            pl.BlockSpec((cout2, 1), lambda i, j: (0, 0)),
        ],
        out_specs=pl.BlockSpec((1, cout2, t_tile), lambda i, j: (i, 0, j)),
        scratch_shapes=[
            pltpu.VMEM((cin2, max(pad, 1)), compute_dtype),       # causal halo
            pltpu.VMEM((cout2, t_tile), jnp.float32),             # accumulator
        ],
    )

    out = pl.pallas_call(
        functools.partial(_complex_conv1d_kernel,
                          k_size=k_size, dilation=dilation, pad=pad),
        out_shape=jax.ShapeDtypeStruct((b, cout2, t_pad), jnp.float32),
        grid_spec=grid_spec,
        compiler_params=pltpu.CompilerParams(
            dimension_semantics=("parallel", "arbitrary"),
            vmem_limit_bytes=vmem_limit),
    )(xb, w_big, b_big)

    # (B, 2C_out, T_pad) -> (2B, C_out, T), the PyTorch layout.
    out = out[:, :, :t].reshape(b, 2, c_out, t)
    return jnp.transpose(out, (1, 0, 2, 3)).reshape(two_b, c_out, t)


# ----------------------------- pure-JAX reference ----------------------------

def _conv_norm_ref(x, w, bias, *, dilation):
    """ConvNorm(pad_mode='causal', stride=1) in NCT layout."""
    k = w.shape[-1]
    pad = dilation * (k - 1)
    y = lax.conv_general_dilated(
        x, w, window_strides=(1,), padding=[(pad, pad)],
        rhs_dilation=(dilation,), dimension_numbers=("NCH", "OIH", "NCH"))
    y = y + bias[None, :, None]
    if pad > 0:
        y = y[:, :, :-pad]
    return y


def _reference(x, w_real, w_imag, b_real, b_imag, *, dilation=1):
    """Mirrors ComplexConv1d.forward with complex_axis=0 exactly."""
    real = _conv_norm_ref(x, w_real, b_real, dilation=dilation)
    imag = _conv_norm_ref(x, w_imag, b_imag, dilation=dilation)
    b = x.shape[0] // 2
    r2r, i2r = real[:b], real[b:]
    r2i, i2i = imag[:b], imag[b:]
    return jnp.concatenate([r2r - i2i, r2i + i2r], axis=0)


if __name__ == "__main__":
    key = jax.random.PRNGKey(0)

    def run_case(b_pairs, c_in, c_out, k_size, t, dilation, t_tile, case_key):
        k1, k2, k3, k4, k5 = jax.random.split(case_key, 5)
        # Module init: normal_(std=0.05) weights; biases are zero in the
        # module, small random biases here to exercise the combine path.
        w_real = 0.05 * jax.random.normal(k1, (c_out, c_in, k_size), jnp.float32)
        w_imag = 0.05 * jax.random.normal(k2, (c_out, c_in, k_size), jnp.float32)
        b_real = 0.05 * jax.random.normal(k3, (c_out,), jnp.float32)
        b_imag = 0.05 * jax.random.normal(k4, (c_out,), jnp.float32)
        x = jax.random.normal(k5, (2 * b_pairs, c_in, t), jnp.float32)

        out = complex_conv1d(x, w_real, w_imag, b_real, b_imag,
                             dilation=dilation, t_tile=t_tile)
        jax.block_until_ready(out)
        assert out.shape == (2 * b_pairs, c_out, t)

        # Tight check: reference fed the same bf16-rounded operands (the
        # kernel accumulates exact bf16 products in f32).
        bf = lambda a: a.astype(jnp.bfloat16).astype(jnp.float32)
        ref_q = _reference(bf(x), bf(w_real), bf(w_imag), b_real, b_imag,
                           dilation=dilation)
        assert bool(jnp.allclose(out, ref_q, atol=2e-3, rtol=2e-3)), \
            float(jnp.max(jnp.abs(out - ref_q)))

        # Loose sanity check against the full-f32 reference.
        ref_f = _reference(x, w_real, w_imag, b_real, b_imag, dilation=dilation)
        assert bool(jnp.allclose(out, ref_f, atol=3e-2, rtol=3e-2)), \
            float(jnp.max(jnp.abs(out - ref_f)))

    key1, key2 = jax.random.split(key)
    # Small config consistent with the module (causal, stride=1, dilation=1).
    run_case(2, 8, 8, 3, 16, 1, None, key1)
    # Multi time-tile + dilation case to exercise the causal carry scratch.
    run_case(2, 8, 8, 3, 384, 2, 128, key2)

    print("KERNEL_OK")
</pallas_src>

<mosaic_0001>
module attributes {stable_mosaic.version = 11 : i64} {
  func.func @_complex_conv1d_kernel(%arg0: i32, %arg1: i32, %arg2: memref<1x16x128xbf16, #tpu.memory_space<vmem>>, %arg3: memref<3x16x16xbf16, #tpu.memory_space<vmem>>, %arg4: memref<16x1xf32, #tpu.memory_space<vmem>>, %arg5: memref<1x16x128xf32, #tpu.memory_space<vmem>>, %arg6: memref<16x2xbf16, #tpu.memory_space<vmem>>, %arg7: memref<16x128xf32, #tpu.memory_space<vmem>>) attributes {dimension_semantics = [#tpu.dimension_semantics<parallel>, #tpu.dimension_semantics<arbitrary>], iteration_bounds = array<i64: 2, 1>, scalar_prefetch = 0 : i64, scratch_operands = 2 : i64, tpu.core_type = #tpu.core_type<tc>, window_params = [{transform_indices = @transform_0, window_bounds = array<i64: 1, 16, 128>}, {pipeline_mode = #tpu.pipeline_mode<synchronous>, transform_indices = @transform_1, window_bounds = array<i64: 3, 16, 16>}, {pipeline_mode = #tpu.pipeline_mode<synchronous>, transform_indices = @transform_2, window_bounds = array<i64: 16, 1>}, {transform_indices = @transform_3, window_bounds = array<i64: 1, 16, 128>}]} {
    %c0 = arith.constant 0 : index
    %c0_0 = arith.constant 0 : index
    %c0_1 = arith.constant 0 : index
    %0 = vector.load %arg2[%c0, %c0_0, %c0_1] : memref<1x16x128xbf16, #tpu.memory_space<vmem>>, vector<1x16x128xbf16>
    %1 = vector.shape_cast %0 : vector<1x16x128xbf16> to vector<16x128xbf16>
    %c0_i32 = arith.constant 0 : i32
    %2 = arith.cmpi eq, %arg1, %c0_i32 : i32
    %3 = arith.extui %2 : i1 to i32
    %c0_i32_2 = arith.constant 0 : i32
    %4 = arith.cmpi ne, %3, %c0_i32_2 : i32
    scf.if %4 {
      %cst_47 = arith.constant 0.000000e+00 : bf16
      %45 = vector.broadcast %cst_47 : bf16 to vector<16x2xbf16>
      %c0_48 = arith.constant 0 : index
      %c0_49 = arith.constant 0 : index
      %46 = vector.load %arg6[%c0_48, %c0_49] : memref<16x2xbf16, #tpu.memory_space<vmem>>, vector<16x2xbf16>
      tpu.vector_store %arg6[%c0_48, %c0_49], %45 {strides = array<i32>} : memref<16x2xbf16, #tpu.memory_space<vmem>>, vector<16x2xbf16>,
    } else {
    }
    %c0_3 = arith.constant 0 : index
    %c0_4 = arith.constant 0 : index
    %5 = vector.load %arg6[%c0_3, %c0_4] : memref<16x2xbf16, #tpu.memory_space<vmem>>, vector<16x2xbf16>
    %c0_5 = arith.constant 0 : index
    %c0_6 = arith.constant 0 : index
    %6 = vector.load %arg4[%c0_5, %c0_6] : memref<16x1xf32, #tpu.memory_space<vmem>>, vector<16x1xf32>
    %7 = vector.shape_cast %6 : vector<16x1xf32> to vector<16x1xf32>
    %8 = vector.broadcast %7 : vector<16x1xf32> to vector<16x128xf32>
    %c0_7 = arith.constant 0 : index
    %c0_8 = arith.constant 0 : index
    %9 = vector.load %arg7[%c0_7, %c0_8] : memref<16x128xf32, #tpu.memory_space<vmem>>, vector<16x128xf32>
    tpu.vector_store %arg7[%c0_7, %c0_8], %8 {strides = array<i32>} : memref<16x128xf32, #tpu.memory_space<vmem>>, vector<16x128xf32>,
    %c0_9 = arith.constant 0 : index
    %c0_10 = arith.constant 0 : index
    %c0_11 = arith.constant 0 : index
    %10 = vector.load %arg3[%c0_9, %c0_10, %c0_11] : memref<3x16x16xbf16, #tpu.memory_space<vmem>>, vector<1x16x16xbf16>
    %11 = vector.shape_cast %10 : vector<1x16x16xbf16> to vector<16x16xbf16>
    %c0_12 = arith.constant 0 : index
    %c2 = arith.constant 2 : index
    %12 = vector.load %arg7[%c0_12, %c2] : memref<16x128xf32, #tpu.memory_space<vmem>>, vector<16x126xf32>
    %13 = vector.extract_strided_slice %1 {offsets = [0, 0], sizes = [16, 126], strides = [1, 1]} : vector<16x128xbf16> to vector<16x126xbf16>
    %cst = arith.constant dense<0.000000e+00> : vector<16x126xf32>
    %14 = tpu.matmul %11, %13, %cst {dimension_numbers = #tpu.dot_dimension_numbers<[1], [0], [0], [1], [0, 0, 1, 1], [], []>} : vector<16x16xbf16>, vector<16x126xbf16>, vector<16x126xf32> -> vector<16x126xf32>
    %15 = arith.addf %12, %14 : vector<16x126xf32>
    %c0_13 = arith.constant 0 : index
    %c2_14 = arith.constant 2 : index
    %16 = vector.load %arg7[%c0_13, %c2_14] : memref<16x128xf32, #tpu.memory_space<vmem>>, vector<16x126xf32>
    tpu.vector_store %arg7[%c0_13, %c2_14], %15 {strides = array<i32>} : memref<16x128xf32, #tpu.memory_space<vmem>>, vector<16x126xf32>,
    %c0_15 = arith.constant 0 : index
    %c0_16 = arith.constant 0 : index
    %17 = vector.load %arg7[%c0_15, %c0_16] : memref<16x128xf32, #tpu.memory_space<vmem>>, vector<16x2xf32>
    %cst_17 = arith.constant dense<0.000000e+00> : vector<16x2xf32>
    %18 = tpu.matmul %11, %5, %cst_17 {dimension_numbers = #tpu.dot_dimension_numbers<[1], [0], [0], [1], [0, 0, 1, 1], [], []>} : vector<16x16xbf16>, vector<16x2xbf16>, vector<16x2xf32> -> vector<16x2xf32>
    %19 = arith.addf %17, %18 : vector<16x2xf32>
    %c0_18 = arith.constant 0 : index
    %c0_19 = arith.constant 0 : index
    %20 = vector.load %arg7[%c0_18, %c0_19] : memref<16x128xf32, #tpu.memory_space<vmem>>, vector<16x2xf32>
    tpu.vector_store %arg7[%c0_18, %c0_19], %19 {strides = array<i32>} : memref<16x128xf32, #tpu.memory_space<vmem>>, vector<16x2xf32>,
    %c1 = arith.constant 1 : index
    %c0_20 = arith.constant 0 : index
    %c0_21 = arith.constant 0 : index
    %21 = vector.load %arg3[%c1, %c0_20, %c0_21] : memref<3x16x16xbf16, #tpu.memory_space<vmem>>, vector<1x16x16xbf16>
    %22 = vector.shape_cast %21 : vector<1x16x16xbf16> to vector<16x16xbf16>
    %c0_22 = arith.constant 0 : index
    %c1_23 = arith.constant 1 : index
    %23 = vector.load %arg7[%c0_22, %c1_23] : memref<16x128xf32, #tpu.memory_space<vmem>>, vector<16x127xf32>
    %24 = vector.extract_strided_slice %1 {offsets = [0, 0], sizes = [16, 127], strides = [1, 1]} : vector<16x128xbf16> to vector<16x127xbf16>
    %cst_24 = arith.constant dense<0.000000e+00> : vector<16x127xf32>
    %25 = tpu.matmul %22, %24, %cst_24 {dimension_numbers = #tpu.dot_dimension_numbers<[1], [0], [0], [1], [0, 0, 1, 1], [], []>} : vector<16x16xbf16>, vector<16x127xbf16>, vector<16x127xf32> -> vector<16x127xf32>
    %26 = arith.addf %23, %25 : vector<16x127xf32>
    %c0_25 = arith.constant 0 : index
    %c1_26 = arith.constant 1 : index
    %27 = vector.load %arg7[%c0_25, %c1_26] : memref<16x128xf32, #tpu.memory_space<vmem>>, vector<16x127xf32>
    tpu.vector_store %arg7[%c0_25, %c1_26], %26 {strides = array<i32>} : memref<16x128xf32, #tpu.memory_space<vmem>>, vector<16x127xf32>,
    %c0_27 = arith.constant 0 : index
    %c0_28 = arith.constant 0 : index
    %28 = vector.load %arg7[%c0_27, %c0_28] : memref<16x128xf32, #tpu.memory_space<vmem>>, vector<16x1xf32>
    %29 = vector.extract_strided_slice %5 {offsets = [0, 1], sizes = [16, 1], strides = [1, 1]} : vector<16x2xbf16> to vector<16x1xbf16>
    %cst_29 = arith.constant dense<0.000000e+00> : vector<16x1xf32>
    %30 = tpu.matmul %22, %29, %cst_29 {dimension_numbers = #tpu.dot_dimension_numbers<[1], [0], [0], [1], [0, 0, 1, 1], [], []>} : vector<16x16xbf16>, vector<16x1xbf16>, vector<16x1xf32> -> vector<16x1xf32>
    %31 = arith.addf %28, %30 : vector<16x1xf32>
    %c0_30 = arith.constant 0 : index
    %c0_31 = arith.constant 0 : index
    %32 = vector.load %arg7[%c0_30, %c0_31] : memref<16x128xf32, #tpu.memory_space<vmem>>, vector<16x1xf32>
    tpu.vector_store %arg7[%c0_30, %c0_31], %31 {strides = array<i32>} : memref<16x128xf32, #tpu.memory_space<vmem>>, vector<16x1xf32>,
    %c2_32 = arith.constant 2 : index
    %c0_33 = arith.constant 0 : index
    %c0_34 = arith.constant 0 : index
    %33 = vector.load %arg3[%c2_32, %c0_33, %c0_34] : memref<3x16x16xbf16, #tpu.memory_space<vmem>>, vector<1x16x16xbf16>
    %34 = vector.shape_cast %33 : vector<1x16x16xbf16> to vector<16x16xbf16>
    %c0_35 = arith.constant 0 : index
    %c0_36 = arith.constant 0 : index
    %35 = vector.load %arg7[%c0_35, %c0_36] : memref<16x128xf32, #tpu.memory_space<vmem>>, vector<16x128xf32>
    %cst_37 = arith.constant dense<0.000000e+00> : vector<16x128xf32>
    %36 = tpu.matmul %34, %1, %cst_37 {dimension_numbers = #tpu.dot_dimension_numbers<[1], [0], [0], [1], [0, 0, 1, 1], [], []>} : vector<16x16xbf16>, vector<16x128xbf16>, vector<16x128xf32> -> vector<16x128xf32>
    %37 = arith.addf %35, %36 : vector<16x128xf32>
    %c0_38 = arith.constant 0 : index
    %c0_39 = arith.constant 0 : index
    %38 = vector.load %arg7[%c0_38, %c0_39] : memref<16x128xf32, #tpu.memory_space<vmem>>, vector<16x128xf32>
    tpu.vector_store %arg7[%c0_38, %c0_39], %37 {strides = array<i32>} : memref<16x128xf32, #tpu.memory_space<vmem>>, vector<16x128xf32>,
    %39 = vector.extract_strided_slice %1 {offsets = [0, 126], sizes = [16, 2], strides = [1, 1]} : vector<16x128xbf16> to vector<16x2xbf16>
    %c0_40 = arith.constant 0 : index
    %c0_41 = arith.constant 0 : index
    %40 = vector.load %arg6[%c0_40, %c0_41] : memref<16x2xbf16, #tpu.memory_space<vmem>>, vector<16x2xbf16>
    tpu.vector_store %arg6[%c0_40, %c0_41], %39 {strides = array<i32>} : memref<16x2xbf16, #tpu.memory_space<vmem>>, vector<16x2xbf16>,
    %c0_42 = arith.constant 0 : index
    %c0_43 = arith.constant 0 : index
    %41 = vector.load %arg7[%c0_42, %c0_43] : memref<16x128xf32, #tpu.memory_space<vmem>>, vector<16x128xf32>
    %c0_44 = arith.constant 0 : index
    %c0_45 = arith.constant 0 : index
    %c0_46 = arith.constant 0 : index
    %42 = vector.load %arg5[%c0_44, %c0_45, %c0_46] : memref<1x16x128xf32, #tpu.memory_space<vmem>>, vector<1x16x128xf32>
    %43 = vector.shape_cast %42 : vector<1x16x128xf32> to vector<16x128xf32>
    %44 = vector.shape_cast %41 : vector<16x128xf32> to vector<1x16x128xf32>
    tpu.vector_store %arg5[%c0_44, %c0_45, %c0_46], %44 {strides = array<i32>} : memref<1x16x128xf32, #tpu.memory_space<vmem>>, vector<1x16x128xf32>,
    return
  }
  func.func @transform_0(%arg0: i32, %arg1: i32) -> (i32, i32, i32) {
    %c0_i32 = arith.constant 0 : i32
    %c0_i32_0 = arith.constant 0 : i32
    return %arg0, %c0_i32, %arg1 : i32, i32, i32
  }
  func.func @transform_1(%arg0: i32, %arg1: i32) -> (i32, i32, i32) {
    %c0_i32 = arith.constant 0 : i32
    %c0_i32_0 = arith.constant 0 : i32
    %c0_i32_1 = arith.constant 0 : i32
    %c0_i32_2 = arith.constant 0 : i32
    return %c0_i32, %c0_i32_0, %c0_i32_1 : i32, i32, i32
  }
  func.func @transform_2(%arg0: i32, %arg1: i32) -> (i32, i32) {
    %c0_i32 = arith.constant 0 : i32
    %c0_i32_0 = arith.constant 0 : i32
    %c0_i32_1 = arith.constant 0 : i32
    return %c0_i32, %c0_i32_0 : i32, i32
  }
  func.func @transform_3(%arg0: i32, %arg1: i32) -> (i32, i32, i32) {
    %c0_i32 = arith.constant 0 : i32
    %c0_i32_0 = arith.constant 0 : i32
    return %arg0, %c0_i32, %arg1 : i32, i32, i32
  }
}

</mosaic_0001>

<bundles_post_ra>
// kernel: tpu_custom_call.1
= control target key start
LH: loop header
LB: loop body
LE: loop exit
PB: predicated region body
PF: predicated region fallthrough
CT: control target
= control target key end

     0   :  { %8 = vsyncpa [#allocation5], 0  ;;  %s1101_s0 = inlined_call_operand.vmem [shape: bf16[2,16,128], index: 0, kind: input, shape index: {}]   ;;  %s1102_s1 = inlined_call_operand.hbm [shape: bf16[3,16,16], index: 1, kind: input, shape index: {}]   ;;  %s1103_s2 = inlined_call_operand.vmem [shape: f32[16,1], index: 2, kind: input, shape index: {}]   ;;  %s1104_s3 = inlined_call_operand.hbm [shape: f32[2,16,128], index: 3, kind: output, shape index: {}]  }
   0x1   :  { %9 = vsyncpa [#allocation6], 0 }
   0x2   :  { %11 = vsyncpa [#allocation6 + $0x1], 0  ;;  %s946_s12 = smov 0   ;;  %s948_s13 = smov 0  }
   0x3   :  { %s950_s14 = smov 0   ;;  %s952_s15 = smov 0  }
   0x4   :  { %s954_s16 = smov 0   ;;  %s956_s17 = smov 0  }
   0x5 LB: > { %s656_s18 = sadd.s32 4294967295, %s912_s17   ;;  %s657_s19 = sadd.s32 4294967294, %s912_s17   ;;  %s912_s17 = sphi %s956_s17, %s17_s17   ;;  %s908_s16 = sphi %s954_s16, %s1113_s16   ;;  %s904_s15 = sphi %s952_s15, %s1112_s15   ;;  %s900_s14 = sphi %s950_s14, %s1111_s14   ;;  %s896_s13 = sphi %s948_s13, %s1110_s13   ;;  %s892_s12 = sphi %s946_s12, %s1109_s12  }
   0x6   : > { %s29_s20 = sadd.s32 1, %s908_s16  ;;  %s108_s21 = sadd.s32 1, %s900_s14 }
   0x7   : > { %p31_p0 = scmp.ge.s32.totalorder %s29_s20, 2  ;;  %p118_p1 = scmp.ne.s32.totalorder %s900_s14, %s896_s13 }
   0x8   : > { %p119_p2 = scmp.eq.s32.totalorder %s656_s18, 1  ;;  %p124_p3 = scmp.ne.s32.totalorder %s896_s13, %s892_s12 }
   0x9   : > { %s1115_s20 = smov (%p31_p0, %s29_s20), 0  ;;  %p125_p5 = scmp.eq.s32.totalorder %s657_s19, 1 }
   0xa   : > { %p986_p4 = por %p119_p2, %p118_p1  ;;  %s103_s23 = ssub.s32 %s908_s16, %s1115_s20 }
   0xb   : > { %p658_p6 = scmp.ge.s32.totalorder %s912_s17, 1  ;;  %p106_p7 = scmp.eq.s32.totalorder %s103_s23, 0 }
   0xc   : > { %p993_p8 = por %p125_p5, %p124_p3  ;;  %p132_p9 = scmp.lt.s32.totalorder %s912_s17, 3 }
   0xd   : > { %s999_s25 = scalar_select %p106_p7, %s900_s14, %s108_s21  }
   0xe   : > { %p1001_p10 = pnand %p658_p6, %p132_p9  ;;  %p1005_p11 = scmp.eq.s32.totalorder %s656_s18, 0 }
   0xf   : > { %s914_s28 = smov [#allocation4]  }
  0x10   : > { %p729_p12 = pneg %p1001_p10  ;;  %s144_s29 = sshll.u32 %s914_s28, 4  ;;  %s145_s29 = int_to_ptr.vmem [resolvable:$true] %s144_s29 }
  0x11   : > { %s817_s30 = scalar_lea.vmem %s145_s29, 384  ;;  %p825_p5 = scmp.lt.s32.totalorder %s145_s29, %s145_s29 }
  0x12   : > { %p730_p13 = pnand %p1005_p11, %p729_p12  ;;  %p818_p1 = scmp.ne.s32.totalorder %s145_s29, %s817_s30 }
  0x13   : > { %p826_p6 = scmp.lt.s32.totalorder %s817_s30, %s817_s30 }
  0x14   : > { %p808_p0 = pneg %p730_p13 }
  0x15   : > { %p827_p7 = por %p826_p6, %p825_p5 }
  0x16   : > { %p820_p2 = pnand %p818_p1, %p808_p0 }
  0x18   : > { %p821_p3 = pneg %p820_p2 }
  0x1a   : > { %p828_p9 = pnand %p827_p7, %p821_p3 }
  0x1c   : > { %831 = shalt.err (!%p828_p9)
}
  0x1d   : > { %s915_s4 = smov 64   ;;  %s916_s5 = smov 4  }
  0x1e   : > { %732 = dma.hbm_to_vmem [thread:$0]  (!%p730_p13), %s1102_s1, 384, %s145_s29, [#allocation5], %s915_s4, %s915_s4, %s916_s5  }
  0x1f   : > { %174 = sbr.rel (%p1001_p10) target bundleno = 417 (0x1a1), region = 32 }
  0x24   : > { %883 = dma.done.wait (%p1005_p11), [#allocation5], 384  }
  0x25   : > { %885 = vsyncadd (%p1005_p11), [#allocation5], 4294966912  ;;  %p201_p12 = scmp.lt.s32.totalorder %s904_s15, 1  ;;  %v917_v0 = vmov 0.0   ;;  %vm918_vm0 = vmmov 0   ;;  %vm216_vm1 = vcmask 11264  }
  0x26   : > { %693 = vmatprep.subr.bf16.mxu0 %v917_v0  ;;  %695 = vmatprep.mubr.msk.bf16.mxu0 %vm918_vm0, %v917_v0  ;;  %v919_v1 = vmov 0   ;;  %v802_v5 = vld [vmem:[#allocation4] sm:$0xff]   ;;  %vm250_vm2 = vcmask 130048   ;;  %s920_s19 = smov 127   ;;  %v221_v7 = vld [vmem:[%s1103_s2] sm:$0xff]  ;;  %v222_v8 = vld [vmem:[%s1103_s2 + $0x8] sm:$0xff] }
  0x27   : > { %s202_s8 = scalar_select %p201_p12, %s904_s15, 1  ;;  %217 = vst.msk [vmem:[#allocation2] sm:$0xf] %vm216_vm1, %v919_v1  ;;  %218 = vst.msk [vmem:[#allocation2 + $0x4] sm:$0xf] %vm216_vm1, %v919_v1  ;;  %699 = vmatprep.subr.bf16.mxu1 %v917_v0  ;;  %701 = vmatprep.mubr.msk.bf16.mxu1 %vm918_vm0, %v917_v0  ;;  %v803_v9 = vld [vmem:[#allocation4 + $0x8] sm:$0xff]  }
  0x28   : > { %799 = vset.pattern.permute.xlu0 %v919_v1  ;;  %800 = vset.pattern.permute.xlu1 %v919_v1  ;;  %v805_v10 = vld [vmem:[#allocation4 + $0x10] sm:$0xff]   ;;  %s921_s28 = smov 2   ;;  %s922_s29 = smov 1   ;;  %vm305_vm3 = vcmask 1047568   ;;  %vm359_vm4 = vcmask 15360   ;;  %vm426_vm5 = vcmask 1047560  }
  0x29   : > { %s681_s9 = sshll.u32 %s202_s8, 3  ;;  %230 = vperm.xlu1 %800, %v222_v8   ;;  %vm477_vm6 = vcmask 7168   ;;  %s198_s30 = sand.u32 1, %s896_s13  }
  0x2a   : > { %s208_s18 = scalar_lea.vmem %s1101_s0, %s681_s9  ;;  %s663_s4 = sshll.u32 %s198_s30, 4 }
  0x2b   : > { %v210_v2 = vld [vmem:[%s208_s18] sm:$0xf]  ;;  %v211_v3 = vld [vmem:[%s208_s18 + $0x4] sm:$0xf]  ;;  %s682_s5 = sshll.u32 %s904_s15, 8  ;;  %s200_s6 = scalar_lea.vmem [#allocation7], %s663_s4 }
  0x2c   : > { %v667_v4 = vcombine.low %v210_v2, %v211_v3  ;;  %s566_s7 = sshll.u32 %s200_s6, 4  ;;  %s1052_s10 = scalar_lea.hbm %s1104_s3, %s682_s5  ;;  %s1054_s7 = int_to_ptr.vmem [resolvable:$true] %s566_s7 }
  0x2d   : > { %s1056_s11 = scalar_lea.sflag [#allocation6], %s198_s30  ;;  %s832_s15 = scalar_lea.vmem %s1054_s7, 256 }
  0x2e   : > { %694 = vmatpush3.bf16.msra.mxu0 %v667_v4  ;;  %v804_v6 = vld [vmem:[#allocation2] sm:$0xff]   ;;  %p833_p10 = scmp.ne.s32.totalorder %s1054_s7, %s832_s15  ;;  %s923_s18 = smov [#allocation7]  }
  0x2f   : > { %705 = vmatprep.subr.bf16.mxu0 %v917_v0  ;;  %431 = vrot.lane.b32.xlu0 %v804_v6, %s920_s19  ;;  %s836_s19 = sshll.u32 %s923_s18, 4  ;;  %s837_s19 = int_to_ptr.vmem [resolvable:$false] %s836_s19 }
  0x30   : > { %700 = vmatpush3.bf16.msra.mxu1 %v804_v6  ;;  %p834_p11 = pnand %p833_p10, %p986_p4  ;;  %s838_s21 = scalar_lea.vmem %s837_s19, 512 }
  0x31   : > { %696 = vmatmul.mubr.msk.bf16.vlgmr.msra.gmra.mxu0 %vm250_vm2, %v802_v5  ;;  %711 = vmatprep.subr.bf16.mxu1 %v917_v0  ;;  %p839_p0 = scmp.lt.s32.totalorder %s1054_s7, %s837_s19  ;;  %p840_p1 = scmp.lt.s32.totalorder %s838_s21, %s832_s15 }
  0x32   : > { %706 = vmatpush3.bf16.msra.mxu0 %v667_v4  ;;  %707 = vmatprep.mubr.msk.bf16.mxu0 %vm918_vm0, %v917_v0  ;;  %p835_p13 = pneg %p834_p11 }
  0x33   : > { %702 = vmatmul.mubr.msk.bf16.vlgmr.msra.gmra.mxu1 %vm250_vm2, %v802_v5  ;;  %717 = vmatprep.subr.bf16.mxu0 %v917_v0  ;;  %p841_p2 = por %p840_p1, %p839_p0 }
  0x34   : > { %713 = vmatprep.mubr.msk.bf16.mxu1 %vm918_vm0, %v917_v0  ;;  %225 = vperm.xlu0 %799, %v221_v7  }
  0x35   : > { %p842_p3 = pnand %p841_p2, %p835_p13 }
  0x39   : > { %708 = vmatmul.mubr.msk.bf16.vlgmr.msra.gmra.mxu0 %vm250_vm2, %v803_v9 }
  0x3a   : > { %718 = vmatpush3.bf16.msra.mxu0 %v667_v4  ;;  %719 = vmatprep.mubr.msk.bf16.mxu0 %vm918_vm0, %v917_v0 }
  0x41   : > { %720 = vmatmul.mubr.msk.bf16.vlgmr.msra.gmra.mxu0 %vm250_vm2, %v805_v10 }
  0xa1   : > { %v432_v11 = vpop.permute.xlu0 %431 }
  0xa2   : > { %712 = vmatpush3.bf16.msra.mxu1 %v432_v11 }
  0xa4   : > { %v231_v13 = vpop.permute.xlu1 %230 }
  0xa5   : > { %714 = vmatmul.mubr.msk.bf16.vlgmr.msra.gmra.mxu1 %vm250_vm2, %v803_v9  ;;  %234 = vst [vmem:[#allocation3 + $0x8] sm:$0xff] %v231_v13 }
  0xaf   : > { %v226_v12 = vpop.permute.xlu0 %225 }
  0xb0   : > { %233 = vst [vmem:[#allocation3] sm:$0xff] %v226_v12 }
  0xf1   : > { %v288_v14 = vpop.f32.mrf.mxu0 }
  0xf2   : > { %297 = vrot.lane.b32.xlu1 %v288_v14, %s921_s28 }
  0xf3   : > { %v697_v15 = vpop.f32.mrf.mxu0  ;;  %v350_v16 = vpop.f32.mrf.mxu1 }
  0xf5   : > { %v291_v17 = vpop.f32.mrf.mxu0  ;;  %v703_v18 = vpop.f32.mrf.mxu1 }
  0xf6   : > { %299 = vrot.lane.b32.xlu1 %v291_v17, %s921_s28 }
  0xf7   : > { %v698_v19 = vpop.f32.mrf.mxu0  ;;  %v353_v20 = vpop.f32.mrf.mxu1 }
  0xf9   : > { %v409_v21 = vpop.f32.mrf.mxu0  ;;  %v704_v22 = vpop.f32.mrf.mxu1 }
  0xfa   : > { %418 = vrot.lane.b32.xlu0 %v409_v21, %s922_s29 }
  0xfb   : > { %v709_v23 = vpop.f32.mrf.mxu0 }
  0xfd   : > { %v412_v24 = vpop.f32.mrf.mxu0 }
  0xfe   : > { %420 = vrot.lane.b32.xlu1 %v412_v24, %s922_s29  ;;  %538 = vrot.lane.b32.xlu0 %v210_v2, %s921_s28 }
  0xff   : > { %v710_v25 = vpop.f32.mrf.mxu0 }
 0x101   : > { %v527_v26 = vpop.f32.mrf.mxu0 }
 0x102   : > { %540 = vrot.lane.b32.xlu1 %v211_v3, %s921_s28 }
 0x103   : > { %v721_v27 = vpop.f32.mrf.mxu0 }
 0x105   : > { %v530_v28 = vpop.f32.mrf.mxu0 }
 0x107   : > { %v722_v29 = vpop.f32.mrf.mxu0 }
 0x164   : > { %v298_v30 = vpop.permute.xlu1 %297 }
 0x165   : > { %v303_v31 = vadd.f32 %v298_v30, %v226_v12  ;;  %v468_v32 = vpop.f32.mrf.mxu1 }
 0x167   : > { %306 = vst.msk [vmem:[#allocation3] sm:$0xff] %vm305_vm3, %v303_v31  ;;  %v715_v34 = vpop.f32.mrf.mxu1 }
 0x168   : > { %v300_v33 = vpop.permute.xlu1 %299 }
 0x169   : > { %v304_v35 = vadd.f32 %v300_v33, %v231_v13  ;;  %v471_v36 = vpop.f32.mrf.mxu1 }
 0x16b   : > { %307 = vst.msk [vmem:[#allocation3 + $0x8] sm:$0xff] %vm305_vm3, %v304_v35  ;;  %v716_v38 = vpop.f32.mrf.mxu1 }
 0x16c   : > { %v419_v37 = vpop.permute.xlu0 %418 }
 0x16e   : > { %v308_v39 = vld [vmem:[#allocation3] sm:$0xff] }
 0x16f   : > { %v357_v40 = vadd.f32 %v350_v16, %v308_v39 }
 0x170   : > { %v421_v41 = vpop.permute.xlu1 %420  ;;  %v539_v42 = vpop.permute.xlu0 %538 }
 0x171   : > { %360 = vst.msk [vmem:[#allocation3] sm:$0xff] %vm359_vm4, %v357_v40 }
 0x172   : > { %545 = vst.msk [vmem:[#allocation2] sm:$0xf] %vm216_vm1, %v539_v42  ;;  %v309_v43 = vld [vmem:[#allocation3 + $0x8] sm:$0xff] }
 0x173   : > { %v358_v44 = vadd.f32 %v353_v20, %v309_v43 }
 0x174   : > { %v541_v45 = vpop.permute.xlu1 %540 }
 0x175   : > { %361 = vst.msk [vmem:[#allocation3 + $0x8] sm:$0xff] %vm359_vm4, %v358_v44 }
 0x176   : > { %546 = vst.msk [vmem:[#allocation2 + $0x4] sm:$0xf] %vm216_vm1, %v541_v45 }
 0x178   : > { %v365_v46 = vld [vmem:[#allocation3] sm:$0xff] }
 0x179   : > { %v424_v47 = vadd.f32 %v419_v37, %v365_v46 }
 0x17b   : > { %427 = vst.msk [vmem:[#allocation3] sm:$0xff] %vm426_vm5, %v424_v47 }
 0x17c   : > { %v366_v48 = vld [vmem:[#allocation3 + $0x8] sm:$0xff] }
 0x17d   : > { %v425_v49 = vadd.f32 %v421_v41, %v366_v48 }
 0x17f   : > { %428 = vst.msk [vmem:[#allocation3 + $0x8] sm:$0xff] %vm426_vm5, %v425_v49 }
 0x182   : > { %v429_v50 = vld [vmem:[#allocation3] sm:$0xff] }
 0x183   : > { %v475_v51 = vadd.f32 %v468_v32, %v429_v50 }
 0x185   : > { %478 = vst.msk [vmem:[#allocation3] sm:$0xff] %vm477_vm6, %v475_v51 }
 0x186   : > { %v430_v52 = vld [vmem:[#allocation3 + $0x8] sm:$0xff] }
 0x187   : > { %v476_v53 = vadd.f32 %v471_v36, %v430_v52 }
 0x189   : > { %479 = vst.msk [vmem:[#allocation3 + $0x8] sm:$0xff] %vm477_vm6, %v476_v53 }
 0x18c   : > { %v483_v54 = vld [vmem:[#allocation3] sm:$0xff] }
 0x18d   : > { %v534_v55 = vadd.f32 %v527_v26, %v483_v54 }
 0x18f   : > { %536 = vst [vmem:[#allocation3] sm:$0xff] %v534_v55  ;;  %549 = vst [vmem:[%s200_s6] sm:$0xff] %v534_v55 }
 0x190   : > { %v484_v56 = vld [vmem:[#allocation3 + $0x8] sm:$0xff] }
 0x191   : > { %v535_v57 = vadd.f32 %v530_v28, %v484_v56 }
 0x193   : > { %537 = vst [vmem:[#allocation3 + $0x8] sm:$0xff] %v535_v57  ;;  %550 = vst [vmem:[%s200_s6 + $0x8] sm:$0xff] %v535_v57 }
 0x194   : > { %845 = shalt.err (!%p842_p3)
}
 0x195   : > { %s846_s23 = scalar_lea.hbm %s1052_s10, 256  ;;  %s850_s28 = scalar_lea.hbm %s1104_s3, 512 }
 0x196   : > { %p847_p5 = scmp.ne.s32.totalorder %s1052_s10, %s846_s23  ;;  %p851_p9 = scmp.lt.s32.totalorder %s1052_s10, %s1104_s3 }
 0x197   : > { %p852_p12 = scmp.lt.s32.totalorder %s850_s28, %s846_s23 }
 0x198   : > { %p848_p6 = pnand %p847_p5, %p986_p4 }
 0x199   : > { %p853_p10 = por %p852_p12, %p851_p9 }
 0x19a   : > { %p849_p7 = pneg %p848_p6 }
 0x19c   : > { %p854_p11 = pnand %p853_p10, %p849_p7 }
 0x19e   : > { %857 = shalt.err (!%p854_p11)
}
 0x19f   : > { %s924_s4 = smov 128   ;;  %s925_s5 = smov 8  }
 0x1a0   : > { %727 = dma.vmem_to_hbm [thread:$0]  (%p986_p4), %s1054_s7, 256, %s1052_s10, %s1056_s11, %s924_s4, %s924_s4, %s925_s5  }
 0x1a1 PF: > { %p739_p13 = scmp.ge.s32.totalorder %s912_s17, 2  ;;  %s581_s6 = sand.u32 1, %s892_s12  }
 0x1a2   : > { %s582_s8 = scalar_lea.sflag [#allocation6], %s581_s6 }
 0x1a3   : > { %p734_p0 = pnand %p739_p13, %p993_p8 }
 0x1a5   : > { %p735_p1 = pneg %p734_p0 }
 0x1a7   : > { %887 = dma.done.wait (%p735_p1), %s582_s8, 256  }
 0x1a8   : > { %889 = vsyncadd (%p735_p1), %s582_s8, 4294967040  ;;  %s17_s17 = sadd.s32 1, %s912_s17   ;;  %s1109_s12 = smov %s896_s13 }
 0x1a9   : > { %p14_p2 = scmp.ge.s32.totalorder %s17_s17, 4   ;;  %s1110_s13 = smov %s900_s14 }
 0x1aa   : > { %s1111_s14 = smov %s999_s25  ;;  %s1112_s15 = smov %s908_s16 }
 0x1ab   : > { %s1113_s16 = smov %s1115_s20  ;;  %16 = sbr.rel (!%p14_p2) target bundleno = 5 (0x5), region = 78 }
 0x1b0   :  { %587 = vsyncpa [#allocation5], 1 }
 0x1b1   :  { %589 = vsyncpa [#allocation5 + $0x1], 1 }
 0x1b2   :  { %590 = vsyncpa [#allocation6], 1 }
 0x1b3   :  { %592 = vsyncpa [#allocation6 + $0x1], 1 }

</bundles_post_ra>
